<compile_context>
chip_gen: v7x
topology: tpu7x:2x2x1
jax: 0.10.0
libtpu: 0.0.40
codegen_flags: <defaults>
</compile_context>

<pallas_src>
import jax
import jax.numpy as jnp
from jax.experimental import pallas as pl
from jax.experimental.pallas import tpu as pltpu

_LANES = 128
_TILE_BYTES = 4 << 20          # ~4 MiB tiles per review (v7x/v6e sweet spot).
_VMEM_LIMIT = 32 << 20         # lift v5e's 16 MiB default scoped VMEM for 4 MiB tiles.
_FALLBACK_MAX_ELEMS = 128 * 1024  # cap for the rare non-128-multiple 1-D fallback.


def _copy_kernel(x_ref, o_ref):
    # Straight copy of the current tile (VMEM load -> VMEM store).
    o_ref[...] = x_ref[...]


def _round_down(v, m):
    return (v // m) * m


def _compiler_params():
    return pltpu.CompilerParams(
        # Independent tiles -> shard across both TensorCores on v7x.
        dimension_semantics=("parallel",),
        vmem_limit_bytes=_VMEM_LIMIT,
    )


def _identity_copy(x):
    """Materialize a distinct copy of x through a tiled, lane-dense Pallas kernel."""
    orig_shape = x.shape
    total = x.size
    dtype = x.dtype
    itemsize = jnp.dtype(dtype).itemsize

    if total == 0:
        return x

    if total % _LANES == 0:
        # Lane-dense path: view as (rows, 128) so every store is a full-width
        # unmasked vst; row-tiled for double-buffered DMA pipelining.
        rows = total // _LANES
        cols = _LANES
        x2d = x.reshape(rows, cols)

        # Sublane multiple per dtype packing: 8 (f32), 16 (bf16/f16), 32 (int8/fp8).
        mult = 8 * max(1, 4 // itemsize)

        target_rows = max(mult, _TILE_BYTES // max(1, cols * itemsize))
        tile_rows = max(mult, _round_down(target_rows, mult))

        if tile_rows >= rows:
            # Whole array fits in one tile.  If it is still big enough to
            # matter, split in two so v7x's 2 TensorCores both get work;
            # otherwise take a single full block (full-dim exemption).
            if rows * cols * itemsize > (1 << 20) and rows >= 2 * mult:
                tile_rows = max(mult, _round_down(-(-rows // 2), mult))
            else:
                tile_rows = rows

        grid = (pl.cdiv(rows, tile_rows),)

        out2d = pl.pallas_call(
            _copy_kernel,
            out_shape=jax.ShapeDtypeStruct((rows, cols), dtype),
            grid=grid,
            in_specs=[pl.BlockSpec((tile_rows, cols), lambda i: (i, 0))],
            out_specs=pl.BlockSpec((tile_rows, cols), lambda i: (i, 0)),
            compiler_params=_compiler_params(),
        )(x2d)
        return out2d.reshape(orig_shape)

    # Rare fallback: total not a multiple of 128.  Copy the flat array in
    # 128-multiple 1-D blocks; only the final partial block's store is masked,
    # so the bulk of the traffic stays lane-dense.
    flat = x.reshape(total)
    tile_elems = _round_down(
        min(max(_LANES, _TILE_BYTES // itemsize), _FALLBACK_MAX_ELEMS), _LANES
    )
    blk = total if tile_elems >= total else tile_elems  # full-dim exemption if single block
    grid = (pl.cdiv(total, blk),)

    out_flat = pl.pallas_call(
        _copy_kernel,
        out_shape=jax.ShapeDtypeStruct((total,), dtype),
        grid=grid,
        in_specs=[pl.BlockSpec((blk,), lambda i: (i,))],
        out_specs=pl.BlockSpec((blk,), lambda i: (i,)),
        compiler_params=_compiler_params(),
    )(flat)
    return out_flat.reshape(orig_shape)


def identical_pool(x, batch=None, *, materialize=False):
    """Pallas equivalent of IdenticalPool.forward(x, batch) -> x.

    Default path returns x directly (the reference forward is a pure identity,
    so the fastest kernel is no kernel).  Set materialize=True to force a
    genuinely distinct output buffer via the tiled Pallas copy kernel.
    """
    del batch  # unused by the reference forward
    if not materialize:
        return x
    return _identity_copy(x)


if __name__ == "__main__":
    key = jax.random.PRNGKey(0)
    kx, kb, k2, k3, k4 = jax.random.split(key, 5)

    # GIN pooling-layer-style input: 8 nodes, hidden=32, 2 graphs.
    x = jax.random.normal(kx, (8, 32), dtype=jnp.float32)
    batch = jax.random.randint(kb, (8,), 0, 2, dtype=jnp.int32)

    # 1) Primary (optimal) path: identity returns x itself — zero HBM traffic.
    out_fast = jax.block_until_ready(identical_pool(x, batch))
    assert out_fast.shape == x.shape and out_fast.dtype == x.dtype
    assert bool(jnp.array_equal(out_fast, x))

    # 2) Materialized-copy path through the lane-dense Pallas kernel.
    out_copy = jax.block_until_ready(identical_pool(x, batch, materialize=True))
    assert out_copy.shape == x.shape and out_copy.dtype == x.dtype
    assert bool(jnp.array_equal(out_copy, x))

    # 3) Larger f32 input exercising a multi-tile parallel grid (1.5 MiB -> 2 tiles).
    x_big = jax.random.normal(k2, (2048, 192), dtype=jnp.float32)
    out_big = jax.block_until_ready(identical_pool(x_big, None, materialize=True))
    assert bool(jnp.array_equal(out_big, x_big))

    # 4) bf16 input exercising the 16-sublane rounding of tile_rows.
    x_bf16 = jax.random.normal(k3, (4096, 320), dtype=jnp.float32).astype(jnp.bfloat16)
    out_bf16 = jax.block_until_ready(identical_pool(x_bf16, None, materialize=True))
    assert bool(jnp.array_equal(out_bf16, x_bf16))

    # 5) Non-128-multiple total exercising the 1-D fallback path.
    x_odd = jax.random.normal(k4, (7, 33), dtype=jnp.float32)
    out_odd = jax.block_until_ready(identical_pool(x_odd, None, materialize=True))
    assert bool(jnp.array_equal(out_odd, x_odd))

    print("KERNEL_OK")
</pallas_src>

<mosaic_0001>
module attributes {stable_mosaic.version = 11 : i64} {
  func.func @_copy_kernel(%arg0: i32, %arg1: memref<2x128xf32, #tpu.memory_space<vmem>>, %arg2: memref<2x128xf32, #tpu.memory_space<vmem>>) attributes {dimension_semantics = [#tpu.dimension_semantics<parallel>], iteration_bounds = array<i64: 1>, scalar_prefetch = 0 : i64, scratch_operands = 0 : i64, tpu.core_type = #tpu.core_type<tc>, window_params = [{transform_indices = @transform_0, window_bounds = array<i64: 2, 128>}, {transform_indices = @transform_1, window_bounds = array<i64: 2, 128>}]} {
    %c0 = arith.constant 0 : index
    %c0_0 = arith.constant 0 : index
    %0 = vector.load %arg1[%c0, %c0_0] : memref<2x128xf32, #tpu.memory_space<vmem>>, vector<2x128xf32>
    %c0_1 = arith.constant 0 : index
    %c0_2 = arith.constant 0 : index
    %1 = vector.load %arg2[%c0_1, %c0_2] : memref<2x128xf32, #tpu.memory_space<vmem>>, vector<2x128xf32>
    tpu.vector_store %arg2[%c0_1, %c0_2], %0 {strides = array<i32>} : memref<2x128xf32, #tpu.memory_space<vmem>>, vector<2x128xf32>,
    return
  }
  func.func @transform_0(%arg0: i32) -> (i32, i32) {
    %c0_i32 = arith.constant 0 : i32
    %c0_i32_0 = arith.constant 0 : i32
    return %arg0, %c0_i32 : i32, i32
  }
  func.func @transform_1(%arg0: i32) -> (i32, i32) {
    %c0_i32 = arith.constant 0 : i32
    %c0_i32_0 = arith.constant 0 : i32
    return %arg0, %c0_i32 : i32, i32
  }
}

</mosaic_0001>

<bundles_post_ra>
// kernel: tpu_custom_call.1
= control target key start
LH: loop header
LB: loop body
LE: loop exit
PB: predicated region body
PF: predicated region fallthrough
CT: control target
= control target key end

     0   :  { %6 = vsyncpa [#allocation3], 0  ;;  %s124_s0 = inlined_call_operand.hbm [shape: f32[2,128], index: 0, kind: input, shape index: {}]   ;;  %s125_s1 = inlined_call_operand.hbm [shape: f32[2,128], index: 1, kind: output, shape index: {}]  }
   0x1   :  { %7 = vsyncpa [#allocation4], 0  ;;  %s88_s6 = smov [#allocation2]   ;;  %s40_s10 = scalar_lea.hbm %s124_s0, 32 }
   0x2   :  { %s14_s7 = sshll.u32 %s88_s6, 4  ;;  %p41_p0 = scmp.ne.s32.totalorder %s124_s0, %s40_s10  ;;  %s15_s7 = int_to_ptr.vmem [resolvable:$true] %s14_s7 }
   0x3   :  { %p44_p1 = scmp.lt.u32.totalorder %s40_s10, %s124_s0 }
   0x5   :  { %p46_p2 = pnand %p44_p1, %p41_p0 }
   0x7   :  { %49 = shalt.err (!%p46_p2)
}
   0x8   :  { %s50_s15 = scalar_lea.vmem %s15_s7, 32  ;;  %p55_p4 = scmp.lt.s32.totalorder %s15_s7, %s15_s7 }
   0x9   :  { %p51_p3 = scmp.ne.s32.totalorder %s15_s7, %s50_s15  ;;  %p56_p5 = scmp.lt.s32.totalorder %s50_s15, %s50_s15 }
   0xb   :  { %p57_p6 = por %p56_p5, %p55_p4 }
   0xd   :  { %p58_p7 = pnand %p57_p6, %p51_p3 }
   0xf   :  { %61 = shalt.err (!%p58_p7)
}
  0x10   :  { %17 = dma.hbm_to_vmem [thread:$0]  %s124_s0, 32, %s15_s7, [#allocation3]  }
  0x11   :  { %84 = dma.done.wait [#allocation3], 32  }
  0x12   :  { %85 = vsyncadd [#allocation3], 4294967264  ;;  %s89_s18 = smov [#allocation5]   ;;  %v21_v0 = vld [vmem:[#allocation2] sm:$0x3] }
  0x13   :  { %s29_s19 = sshll.u32 %s89_s18, 4  ;;  %22 = vst [vmem:[#allocation5] sm:$0x3] %v21_v0  ;;  %s30_s19 = int_to_ptr.vmem [resolvable:$true] %s29_s19 }
  0x14   :  { %s62_s20 = scalar_lea.vmem %s30_s19, 32  ;;  %p67_p9 = scmp.lt.s32.totalorder %s30_s19, %s30_s19 }
  0x15   :  { %p63_p8 = scmp.ne.s32.totalorder %s30_s19, %s62_s20  ;;  %p68_p10 = scmp.lt.s32.totalorder %s62_s20, %s62_s20 }
  0x17   :  { %p69_p11 = por %p68_p10, %p67_p9 }
  0x19   :  { %p70_p12 = pnand %p69_p11, %p63_p8 }
  0x1b   :  { %73 = shalt.err (!%p70_p12)
}
  0x1c   :  { %s74_s23 = scalar_lea.hbm %s125_s1, 32 }
  0x1d   :  { %p75_p13 = scmp.ne.s32.totalorder %s125_s1, %s74_s23  ;;  %p78_p0 = scmp.lt.u32.totalorder %s74_s23, %s125_s1 }
  0x1f   :  { %p80_p1 = pnand %p78_p0, %p75_p13 }
  0x21   :  { %83 = shalt.err (!%p80_p1)
}
  0x22   :  { %32 = dma.vmem_to_hbm [thread:$0]  %s30_s19, 32, %s125_s1, [#allocation4]  }
  0x23   :  { %86 = dma.done.wait [#allocation4], 32  }
  0x24   :  { %87 = vsyncadd [#allocation4], 4294967264 }
  0x25   :  { %36 = vsyncpa [#allocation3], 1 }
  0x26   :  { %37 = vsyncpa [#allocation4], 1 }

</bundles_post_ra>
